<compile_context>
chip_gen: v7x
topology: tpu7x:2x2x1
jax: 0.10.0
libtpu: 0.0.40
codegen_flags: <defaults>
</compile_context>

<pallas_src>
import jax
import jax.numpy as jnp
from jax.experimental import pallas as pl
from jax.experimental.pallas import tpu as pltpu

N_IN = 24
N_HID = 512
N_OUT = 4
LANES = 128            # lane-dense padded output width
DEFAULT_TB = 1024      # batch tile: (TB,512) f32 hidden = 2 MiB -> fits every gen


def _round_up(n, m):
    return ((n + m - 1) // m) * m


def agent_nn_kernel(x_ref, w1_ref, b1_ref, w2_ref, b2_ref, o_ref):
    # Layer 1: (TB, 24) @ (24, 512) + (1, 512) -> tanh   (f32 MXU accumulate)
    h = jnp.dot(x_ref[...], w1_ref[...], preferred_element_type=jnp.float32)
    h = jnp.tanh(h + b1_ref[...])
    # Layer 2: (TB, 512) @ (512, 128) + (1, 128) -> tanh (lane-dense output)
    y = jnp.dot(h, w2_ref[...], preferred_element_type=jnp.float32)
    o_ref[...] = jnp.tanh(y + b2_ref[...]).astype(o_ref.dtype)


def agent_nn_forward(x, w1, b1, w2, b2, *, tb=DEFAULT_TB):
    """x: (B, 24) f32; w1: (24, 512); b1: (512,); w2: (512, 4); b2: (4,)."""
    B = x.shape[0]

    # Choose batch tile: multiple of 8, never larger than the (padded) batch.
    tb = min(tb, _round_up(B, 8))
    b_pad = _round_up(B, tb)
    if b_pad != B:
        x = jnp.pad(x, ((0, b_pad - B), (0, 0)))

    # Biases as 2-D rows (single broadcast per tile inside the kernel).
    b1_2d = b1.reshape(1, N_HID).astype(jnp.float32)

    # Zero-pad layer-2 params to 128 output lanes (lane-dense stores).
    w2_p = jnp.zeros((N_HID, LANES), jnp.float32).at[:, :N_OUT].set(w2)
    b2_p = jnp.zeros((1, LANES), jnp.float32).at[0, :N_OUT].set(b2)

    out = pl.pallas_call(
        agent_nn_kernel,
        out_shape=jax.ShapeDtypeStruct((b_pad, LANES), jnp.float32),
        grid=(b_pad // tb,),
        in_specs=[
            pl.BlockSpec((tb, N_IN), lambda i: (i, 0)),      # streamed per tile
            pl.BlockSpec((N_IN, N_HID), lambda i: (0, 0)),   # resident weights
            pl.BlockSpec((1, N_HID), lambda i: (0, 0)),      # resident bias
            pl.BlockSpec((N_HID, LANES), lambda i: (0, 0)),  # resident weights
            pl.BlockSpec((1, LANES), lambda i: (0, 0)),      # resident bias
        ],
        out_specs=pl.BlockSpec((tb, LANES), lambda i: (i, 0)),
        compiler_params=pltpu.CompilerParams(
            dimension_semantics=("parallel",),
        ),
    )(x, w1.astype(jnp.float32), b1_2d, w2_p, b2_p)

    # Strip batch padding and the lane padding of the final layer.
    return out[:B, :N_OUT]


def reference_forward(x, w1, b1, w2, b2):
    h = jnp.tanh(x @ w1 + b1)
    return jnp.tanh(h @ w2 + b2)


if __name__ == "__main__":
    key = jax.random.PRNGKey(0)
    k_x, k_w1, k_b1, k_w2, k_b2 = jax.random.split(key, 5)

    B = 8
    x = jax.random.normal(k_x, (B, N_IN), dtype=jnp.float32)

    # Deterministic synthetic parameters (torch Linear-ish scale).
    w1 = jax.random.uniform(k_w1, (N_IN, N_HID), jnp.float32, -0.2, 0.2)
    b1 = jax.random.uniform(k_b1, (N_HID,), jnp.float32, -0.2, 0.2)
    w2 = jax.random.uniform(k_w2, (N_HID, N_OUT), jnp.float32, -0.04, 0.04)
    b2 = jax.random.uniform(k_b2, (N_OUT,), jnp.float32, -0.04, 0.04)

    out = agent_nn_forward(x, w1, b1, w2, b2)
    out = jax.block_until_ready(out)

    ref = reference_forward(x, w1, b1, w2, b2)
    assert out.shape == (B, N_OUT)
    assert jnp.allclose(out, ref, atol=1e-5, rtol=1e-5), "mismatch vs reference"

    # Also exercise a batch that is tiled across multiple grid steps and is
    # not a multiple of the tile (padding path), at a modest size.
    B2 = 2500
    x2 = jax.random.normal(k_x, (B2, N_IN), dtype=jnp.float32)
    out2 = jax.block_until_ready(agent_nn_forward(x2, w1, b1, w2, b2))
    ref2 = reference_forward(x2, w1, b1, w2, b2)
    assert out2.shape == (B2, N_OUT)
    assert jnp.allclose(out2, ref2, atol=1e-5, rtol=1e-5), "mismatch (tiled batch)"

    print("KERNEL_OK")
</pallas_src>

<mosaic_0001>
module attributes {stable_mosaic.version = 11 : i64} {
  func.func @agent_nn_kernel(%arg0: i32, %arg1: memref<8x24xf32, #tpu.memory_space<vmem>>, %arg2: memref<24x512xf32, #tpu.memory_space<vmem>>, %arg3: memref<1x512xf32, #tpu.memory_space<vmem>>, %arg4: memref<512x128xf32, #tpu.memory_space<vmem>>, %arg5: memref<1x128xf32, #tpu.memory_space<vmem>>, %arg6: memref<8x128xf32, #tpu.memory_space<vmem>>) attributes {dimension_semantics = [#tpu.dimension_semantics<parallel>], iteration_bounds = array<i64: 1>, scalar_prefetch = 0 : i64, scratch_operands = 0 : i64, tpu.core_type = #tpu.core_type<tc>, window_params = [{transform_indices = @transform_0, window_bounds = array<i64: 8, 24>}, {pipeline_mode = #tpu.pipeline_mode<synchronous>, transform_indices = @transform_1, window_bounds = array<i64: 24, 512>}, {pipeline_mode = #tpu.pipeline_mode<synchronous>, transform_indices = @transform_2, window_bounds = array<i64: 1, 512>}, {pipeline_mode = #tpu.pipeline_mode<synchronous>, transform_indices = @transform_3, window_bounds = array<i64: 512, 128>}, {pipeline_mode = #tpu.pipeline_mode<synchronous>, transform_indices = @transform_4, window_bounds = array<i64: 1, 128>}, {transform_indices = @transform_5, window_bounds = array<i64: 8, 128>}]} {
    %c0 = arith.constant 0 : index
    %c0_0 = arith.constant 0 : index
    %0 = vector.load %arg1[%c0, %c0_0] : memref<8x24xf32, #tpu.memory_space<vmem>>, vector<8x24xf32>
    %c0_1 = arith.constant 0 : index
    %c0_2 = arith.constant 0 : index
    %1 = vector.load %arg2[%c0_1, %c0_2] : memref<24x512xf32, #tpu.memory_space<vmem>>, vector<24x512xf32>
    %cst = arith.constant dense<0.000000e+00> : vector<8x512xf32>
    %2 = tpu.matmul %0, %1, %cst {dimension_numbers = #tpu.dot_dimension_numbers<[1], [0], [0], [1], [0, 0, 1, 1], [], []>} : vector<8x24xf32>, vector<24x512xf32>, vector<8x512xf32> -> vector<8x512xf32>
    %c0_3 = arith.constant 0 : index
    %c0_4 = arith.constant 0 : index
    %3 = vector.load %arg3[%c0_3, %c0_4] : memref<1x512xf32, #tpu.memory_space<vmem>>, vector<1x512xf32>
    %4 = vector.broadcast %3 : vector<1x512xf32> to vector<8x512xf32>
    %5 = arith.addf %2, %4 : vector<8x512xf32>
    %6 = math.tanh %5 : vector<8x512xf32>
    %c0_5 = arith.constant 0 : index
    %c0_6 = arith.constant 0 : index
    %7 = vector.load %arg4[%c0_5, %c0_6] : memref<512x128xf32, #tpu.memory_space<vmem>>, vector<512x128xf32>
    %cst_7 = arith.constant dense<0.000000e+00> : vector<8x128xf32>
    %8 = tpu.matmul %6, %7, %cst_7 {dimension_numbers = #tpu.dot_dimension_numbers<[1], [0], [0], [1], [0, 0, 1, 1], [], []>} : vector<8x512xf32>, vector<512x128xf32>, vector<8x128xf32> -> vector<8x128xf32>
    %c0_8 = arith.constant 0 : index
    %c0_9 = arith.constant 0 : index
    %9 = vector.load %arg5[%c0_8, %c0_9] : memref<1x128xf32, #tpu.memory_space<vmem>>, vector<1x128xf32>
    %10 = vector.broadcast %9 : vector<1x128xf32> to vector<8x128xf32>
    %11 = arith.addf %8, %10 : vector<8x128xf32>
    %12 = math.tanh %11 : vector<8x128xf32>
    %c0_10 = arith.constant 0 : index
    %c0_11 = arith.constant 0 : index
    %13 = vector.load %arg6[%c0_10, %c0_11] : memref<8x128xf32, #tpu.memory_space<vmem>>, vector<8x128xf32>
    tpu.vector_store %arg6[%c0_10, %c0_11], %12 {strides = array<i32>} : memref<8x128xf32, #tpu.memory_space<vmem>>, vector<8x128xf32>,
    return
  }
  func.func @transform_0(%arg0: i32) -> (i32, i32) {
    %c0_i32 = arith.constant 0 : i32
    %c0_i32_0 = arith.constant 0 : i32
    return %arg0, %c0_i32 : i32, i32
  }
  func.func @transform_1(%arg0: i32) -> (i32, i32) {
    %c0_i32 = arith.constant 0 : i32
    %c0_i32_0 = arith.constant 0 : i32
    %c0_i32_1 = arith.constant 0 : i32
    return %c0_i32, %c0_i32_0 : i32, i32
  }
  func.func @transform_2(%arg0: i32) -> (i32, i32) {
    %c0_i32 = arith.constant 0 : i32
    %c0_i32_0 = arith.constant 0 : i32
    %c0_i32_1 = arith.constant 0 : i32
    return %c0_i32, %c0_i32_0 : i32, i32
  }
  func.func @transform_3(%arg0: i32) -> (i32, i32) {
    %c0_i32 = arith.constant 0 : i32
    %c0_i32_0 = arith.constant 0 : i32
    %c0_i32_1 = arith.constant 0 : i32
    return %c0_i32, %c0_i32_0 : i32, i32
  }
  func.func @transform_4(%arg0: i32) -> (i32, i32) {
    %c0_i32 = arith.constant 0 : i32
    %c0_i32_0 = arith.constant 0 : i32
    %c0_i32_1 = arith.constant 0 : i32
    return %c0_i32, %c0_i32_0 : i32, i32
  }
  func.func @transform_5(%arg0: i32) -> (i32, i32) {
    %c0_i32 = arith.constant 0 : i32
    %c0_i32_0 = arith.constant 0 : i32
    return %arg0, %c0_i32 : i32, i32
  }
}

</mosaic_0001>

<bundles_post_ra>
// kernel: tpu_custom_call.1
= control target key start
LH: loop header
LB: loop body
LE: loop exit
PB: predicated region body
PF: predicated region fallthrough
CT: control target
= control target key end

     0   :  { %10 = vsyncpa [#allocation3], 0  ;;  %s827_s0 = inlined_call_operand.hbm [shape: f32[8,24], index: 0, kind: input, shape index: {}]   ;;  %s828_s1 = inlined_call_operand.hbm [shape: f32[24,512], index: 1, kind: input, shape index: {}]   ;;  %s829_s2 = inlined_call_operand.vmem [shape: f32[1,512], index: 2, kind: input, shape index: {}]   ;;  %s830_s3 = inlined_call_operand.hbm [shape: f32[512,128], index: 3, kind: input, shape index: {}]   ;;  %s831_s4 = inlined_call_operand.vmem [shape: f32[1,128], index: 4, kind: input, shape index: {}]   ;;  %s832_s5 = inlined_call_operand.hbm [shape: f32[8,128], index: 5, kind: output, shape index: {}]  }
   0x1   :  { %11 = vsyncpa [#allocation6], 0 }
   0x2   :  { %12 = vsyncpa [#allocation4], 0  ;;  %s732_s18 = smov [#allocation5]   ;;  %s638_s22 = scalar_lea.hbm %s828_s1, 1536 }
   0x3   :  { %s28_s19 = sshll.u32 %s732_s18, 4  ;;  %p639_p0 = scmp.ne.s32.totalorder %s828_s1, %s638_s22  ;;  %s29_s19 = int_to_ptr.vmem [resolvable:$true] %s28_s19 }
   0x4   :  { %p642_p1 = scmp.lt.u32.totalorder %s638_s22, %s828_s1 }
   0x6   :  { %p644_p2 = pnand %p642_p1, %p639_p0 }
   0x8   :  { %647 = shalt.err (!%p644_p2)
}
   0x9   :  { %s648_s27 = scalar_lea.vmem %s29_s19, 1536  ;;  %p653_p4 = scmp.lt.s32.totalorder %s29_s19, %s29_s19 }
   0xa   :  { %p649_p3 = scmp.ne.s32.totalorder %s29_s19, %s648_s27  ;;  %p654_p5 = scmp.lt.s32.totalorder %s648_s27, %s648_s27 }
   0xc   :  { %p655_p6 = por %p654_p5, %p653_p4 }
   0xe   :  { %p656_p7 = pnand %p655_p6, %p649_p3 }
  0x10   :  { %659 = shalt.err (!%p656_p7)
}
  0x11   :  { %s733_s28 = smov 512   ;;  %s734_s29 = smov 32  }
  0x12   :  { %34 = dma.hbm_to_vmem [thread:$0]  %s828_s1, 1536, %s29_s19, [#allocation6], %s733_s28, %s733_s28, %s734_s29  }
  0x13   :  { %s735_s7 = smov [#allocation2]   ;;  %s736_s9 = smov [#allocation7]  }
  0x14   :  { %s19_s8 = sshll.u32 %s735_s7, 4  ;;  %s42_s10 = sshll.u32 %s736_s9, 4  ;;  %s20_s8 = int_to_ptr.vmem [resolvable:$true] %s19_s8  ;;  %s43_s10 = int_to_ptr.vmem [resolvable:$true] %s42_s10 }
  0x15   :  { %s660_s13 = scalar_lea.hbm %s827_s0, 128 }
  0x16   :  { %p661_p8 = scmp.ne.s32.totalorder %s827_s0, %s660_s13  ;;  %p664_p9 = scmp.lt.u32.totalorder %s660_s13, %s827_s0 }
  0x18   :  { %p666_p10 = pnand %p664_p9, %p661_p8 }
  0x1a   :  { %669 = shalt.err (!%p666_p10)
}
  0x1b   :  { %s670_s1 = scalar_lea.vmem %s20_s8, 128  ;;  %p675_p12 = scmp.lt.s32.totalorder %s20_s8, %s20_s8 }
  0x1c   :  { %p671_p11 = scmp.ne.s32.totalorder %s20_s8, %s670_s1  ;;  %p676_p13 = scmp.lt.s32.totalorder %s670_s1, %s670_s1 }
  0x1e   :  { %p677_p0 = por %p676_p13, %p675_p12 }
  0x20   :  { %p678_p1 = pnand %p677_p0, %p671_p11 }
  0x22   :  { %681 = shalt.err (!%p678_p1)
}
  0x23   :  { %22 = dma.hbm_to_vmem [thread:$0]  %s827_s0, 128, %s20_s8, [#allocation3]  }
  0x24   :  { %s682_s22 = scalar_lea.hbm %s830_s3, 8192 }
  0x25   :  { %p683_p2 = scmp.ne.s32.totalorder %s830_s3, %s682_s22  ;;  %p686_p3 = scmp.lt.u32.totalorder %s682_s22, %s830_s3 }
  0x27   :  { %p688_p4 = pnand %p686_p3, %p683_p2 }
  0x29   :  { %691 = shalt.err (!%p688_p4)
}
  0x2a   :  { %s692_s27 = scalar_lea.vmem %s43_s10, 8192  ;;  %p697_p6 = scmp.lt.s32.totalorder %s43_s10, %s43_s10 }
  0x2b   :  { %p693_p5 = scmp.ne.s32.totalorder %s43_s10, %s692_s27  ;;  %p698_p7 = scmp.lt.s32.totalorder %s692_s27, %s692_s27 }
  0x2d   :  { %p699_p8 = por %p698_p7, %p697_p6 }
  0x2f   :  { %p700_p9 = pnand %p699_p8, %p693_p5 }
  0x31   :  { %703 = shalt.err (!%p700_p9)
}
  0x32   :  { %s737_s0 = smov 128   ;;  %s738_s28 = smov 8  }
  0x33   :  { %48 = dma.hbm_to_vmem [thread:$0]  %s830_s3, 8192, %s43_s10, [#allocation6], %s737_s0, %s737_s0, %s738_s28  }
  0x34   :  { %726 = dma.done.wait [#allocation3], 128  }
  0x35   :  { %727 = vsyncadd [#allocation3], 4294967168 }
  0x36   :  { %728 = dma.done.wait [#allocation6], 9728  }
  0x37   :  { %729 = vsyncadd [#allocation6], 4294957568  ;;  %v739_v0 = vmov 0.0   ;;  %v62_v1 = vld [vmem:[#allocation5 + $0x8] sm:$0xff]  ;;  %v64_v3 = vld [vmem:[#allocation5 + $0x18] sm:$0xff]  ;;  %vm95_vm0 = vcmask 195584  }
  0x38   :  { %163 = vmatprep.mubr.f32.mxu0 %v739_v0  ;;  %234 = vmatprep.mubr.f32.mxu1 %v739_v0  ;;  %v66_v2 = vld [vmem:[#allocation5 + $0x28] sm:$0xff]  ;;  %v68_v5 = vld [vmem:[#allocation5 + $0x38] sm:$0xff]  ;;  %v61_v6 = vld [vmem:[#allocation5] sm:$0xff]  ;;  %s740_s8 = smov [#allocation8]  }
  0x39   :  { %v547_v4 = vpack.c.bf16 %v66_v2, %v62_v1  ;;  %v65_v7 = vld [vmem:[#allocation5 + $0x20] sm:$0xff]  ;;  %v551_v8 = vpack.c.bf16 %v68_v5, %v64_v3  ;;  %v63_v10 = vld [vmem:[#allocation5 + $0x10] sm:$0xff]  ;;  %v70_v12 = vld [vmem:[#allocation5 + $0x48] sm:$0xff]  ;;  %s464_s9 = sshll.u32 %s740_s8, 4  ;;  %s465_s9 = int_to_ptr.vmem [resolvable:$true] %s464_s9 }
  0x3a   :  { %v549_v9 = vpack.c.bf16 %v65_v7, %v61_v6  ;;  %v67_v11 = vld [vmem:[#allocation5 + $0x30] sm:$0xff]  ;;  %v72_v14 = vld [vmem:[#allocation5 + $0x58] sm:$0xff]  ;;  %v69_v15 = vld [vmem:[#allocation5 + $0x40] sm:$0xff]  ;;  %s704_s10 = scalar_lea.vmem %s465_s9, 128  ;;  %p709_p11 = scmp.lt.s32.totalorder %s465_s9, %s465_s9 }
  0x3b   :  { %548 = vmatprep.subr.bf16.mxu0 %v547_v4  ;;  %v553_v13 = vpack.c.bf16 %v67_v11, %v63_v10  ;;  %552 = vmatprep.subr.bf16.mxu1 %v551_v8  ;;  %v71_v16 = vld [vmem:[#allocation5 + $0x50] sm:$0xff]  ;;  %v60_v17 = vld [vmem:[#allocation2] sm:$0xff]  ;;  %v261_v18 = vld [vmem:[#allocation7 + $0x80] sm:$0xff]  ;;  %p705_p10 = scmp.ne.s32.totalorder %s465_s9, %s704_s10  ;;  %p710_p12 = scmp.lt.s32.totalorder %s704_s10, %s704_s10 }
  0x3c   :  { %550 = vmatpush1.bf16.msra.mxu0 %v549_v9  ;;  %v262_v19 = vld [vmem:[#allocation7 + $0x88] sm:$0xff]  ;;  %v293_v20 = vld [vmem:[#allocation7 + $0x180] sm:$0xff]  ;;  %v263_v29 = vld [vmem:[#allocation7 + $0x90] sm:$0xff] }
  0x3d   :  { %554 = vmatpush1.bf16.msra.mxu1 %v553_v13  ;;  %103 = vmatprep.subr.mxu0 %v70_v12  ;;  %v294_v21 = vld [vmem:[#allocation7 + $0x188] sm:$0xff]  ;;  %v245_v22 = vld [vmem:[#allocation7] sm:$0xff]  ;;  %v555_v23 = vpack.c.bf16 %v262_v19, %v261_v18  ;;  %v264_v30 = vld [vmem:[#allocation7 + $0x98] sm:$0xff]  ;;  %p711_p13 = por %p710_p12, %p709_p11 }
  0x3e   :  { %174 = vmatprep.subr.mxu1 %v72_v14  ;;  %v246_v24 = vld [vmem:[#allocation7 + $0x8] sm:$0xff]  ;;  %v277_v25 = vld [vmem:[#allocation7 + $0x100] sm:$0xff]  ;;  %v587_v27 = vpack.c.bf16 %v294_v21, %v293_v20  ;;  %v295_v31 = vld [vmem:[#allocation7 + $0x190] sm:$0xff]  ;;  %v559_v33 = vpack.c.bf16 %v264_v30, %v263_v29 }
  0x3f   :  { %v278_v26 = vld [vmem:[#allocation7 + $0x108] sm:$0xff]  ;;  %v557_v28 = vpack.c.bf16 %v246_v24, %v245_v22  ;;  %v296_v34 = vld [vmem:[#allocation7 + $0x198] sm:$0xff]  ;;  %v247_v35 = vld [vmem:[#allocation7 + $0x10] sm:$0xff]  ;;  %p712_p0 = pnand %p711_p13, %p705_p10 }
  0x40   :  { %104 = vmatpush1.msra.mxu0 %v69_v15  ;;  %v589_v32 = vpack.c.bf16 %v278_v26, %v277_v25  ;;  %v248_v36 = vld [vmem:[#allocation7 + $0x18] sm:$0xff]  ;;  %v591_v37 = vpack.c.bf16 %v296_v34, %v295_v31  ;;  %v279_v38 = vld [vmem:[#allocation7 + $0x110] sm:$0xff]  ;;  %v265_v40 = vld [vmem:[#allocation7 + $0xa0] sm:$0xff] }
  0x41   :  { %175 = vmatpush1.msra.mxu1 %v71_v16  ;;  %474 = vmatmul.mubr.msk.f32.vlgmr.msra.gmra.mrb[0].mxu0 %vm95_vm0, %v60_v17  ;;  %v280_v39 = vld [vmem:[#allocation7 + $0x118] sm:$0xff]  ;;  %v266_v41 = vld [vmem:[#allocation7 + $0xa8] sm:$0xff]  ;;  %v297_v42 = vld [vmem:[#allocation7 + $0x1a0] sm:$0xff]  ;;  %v561_v44 = vpack.c.bf16 %v248_v36, %v247_v35 }
  0x42   :  { %475 = vmatmul.mubr.msk.f32.vlgmr.msra.gmra.mrb[0].mxu1 %vm95_vm0, %v60_v17  ;;  %556 = vmatprep.subr.bf16.mxu0 %v555_v23  ;;  %v298_v43 = vld [vmem:[#allocation7 + $0x1a8] sm:$0xff]  ;;  %v593_v45 = vpack.c.bf16 %v280_v39, %v279_v38  ;;  %v563_v46 = vpack.c.bf16 %v266_v41, %v265_v40  ;;  %v249_v47 = vld [vmem:[#allocation7 + $0x20] sm:$0xff]  ;;  %v267_v52 = vld [vmem:[#allocation7 + $0xb0] sm:$0xff] }
  0x43   :  { %588 = vmatprep.subr.bf16.mxu1 %v587_v27  ;;  %558 = vmatpush3.bf16.msra.mxu0 %v557_v28  ;;  %v250_v48 = vld [vmem:[#allocation7 + $0x28] sm:$0xff]  ;;  %v281_v49 = vld [vmem:[#allocation7 + $0x120] sm:$0xff]  ;;  %v595_v50 = vpack.c.bf16 %v298_v43, %v297_v42  ;;  %v268_v53 = vld [vmem:[#allocation7 + $0xb8] sm:$0xff] }
  0x44   :  { %590 = vmatpush3.bf16.msra.mxu1 %v589_v32  ;;  %560 = vmatprep.subr.bf16.mxu0 %v559_v33  ;;  %v282_v51 = vld [vmem:[#allocation7 + $0x128] sm:$0xff]  ;;  %v299_v54 = vld [vmem:[#allocation7 + $0x1b0] sm:$0xff]  ;;  %v300_v55 = vld [vmem:[#allocation7 + $0x1b8] sm:$0xff]  ;;  %v565_v56 = vpack.c.bf16 %v250_v48, %v249_v47  ;;  %v567_v58 = vpack.c.bf16 %v268_v53, %v267_v52 }
  0x45   :  { %592 = vmatprep.subr.bf16.mxu1 %v591_v37  ;;  %v597_v57 = vpack.c.bf16 %v282_v51, %v281_v49  ;;  %v251_v59 = vld [vmem:[#allocation7 + $0x30] sm:$0xff]  ;;  %v252_v60 = vld [vmem:[#allocation7 + $0x38] sm:$0xff]  ;;  %v599_v61 = vpack.c.bf16 %v300_v55, %v299_v54  ;;  %v269_v2 = vld [vmem:[#allocation7 + $0xc0] sm:$0xff] }
  0x46   :  { %v283_v62 = vld [vmem:[#allocation7 + $0x130] sm:$0xff]  ;;  %v284_v63 = vld [vmem:[#allocation7 + $0x138] sm:$0xff]  ;;  %v569_v0 = vpack.c.bf16 %v252_v60, %v251_v59  ;;  %v270_v3 = vld [vmem:[#allocation7 + $0xc8] sm:$0xff] }
  0x47   :  { %562 = vmatpush3.bf16.msra.mxu0 %v561_v44  ;;  %v601_v1 = vpack.c.bf16 %v284_v63, %v283_v62  ;;  %v301_v4 = vld [vmem:[#allocation7 + $0x1c0] sm:$0xff]  ;;  %v571_v5 = vpack.c.bf16 %v270_v3, %v269_v2  ;;  %v302_v6 = vld [vmem:[#allocation7 + $0x1c8] sm:$0xff]  ;;  %v271_v14 = vld [vmem:[#allocation7 + $0xd0] sm:$0xff] }
  0x48   :  { %594 = vmatpush3.bf16.msra.mxu1 %v593_v45  ;;  %564 = vmatprep.subr.bf16.mxu0 %v563_v46  ;;  %v603_v7 = vpack.c.bf16 %v302_v6, %v301_v4  ;;  %v253_v8 = vld [vmem:[#allocation7 + $0x40] sm:$0xff]  ;;  %v254_v9 = vld [vmem:[#allocation7 + $0x48] sm:$0xff]  ;;  %v272_v15 = vld [vmem:[#allocation7 + $0xd8] sm:$0xff] }
  0x49   :  { %596 = vmatprep.subr.bf16.mxu1 %v595_v50  ;;  %v285_v10 = vld [vmem:[#allocation7 + $0x140] sm:$0xff]  ;;  %v573_v11 = vpack.c.bf16 %v254_v9, %v253_v8  ;;  %v286_v12 = vld [vmem:[#allocation7 + $0x148] sm:$0xff]  ;;  %v303_v16 = vld [vmem:[#allocation7 + $0x1d0] sm:$0xff]  ;;  %v575_v17 = vpack.c.bf16 %v272_v15, %v271_v14  ;;  %v75_v50 = vlaneseq }
  0x4a   :  { %v605_v13 = vpack.c.bf16 %v286_v12, %v285_v10  ;;  %v304_v18 = vld [vmem:[#allocation7 + $0x1d8] sm:$0xff]  ;;  %v255_v19 = vld [vmem:[#allocation7 + $0x50] sm:$0xff]  ;;  %v273_v26 = vld [vmem:[#allocation7 + $0xe0] sm:$0xff] }
  0x4b   :  { %566 = vmatpush3.bf16.msra.mxu0 %v565_v56  ;;  %v256_v20 = vld [vmem:[#allocation7 + $0x58] sm:$0xff]  ;;  %v607_v21 = vpack.c.bf16 %v304_v18, %v303_v16  ;;  %v287_v23 = vld [vmem:[#allocation7 + $0x150] sm:$0xff]  ;;  %v274_v27 = vld [vmem:[#allocation7 + $0xe8] sm:$0xff]  ;;  %v76_v51 = vshrl.u32 %v75_v50, 7 }
  0x4c   :  { %598 = vmatpush3.bf16.msra.mxu1 %v597_v57  ;;  %568 = vmatprep.subr.bf16.mxu0 %v567_v58  ;;  %v577_v22 = vpack.c.bf16 %v256_v20, %v255_v19  ;;  %v288_v24 = vld [vmem:[#allocation7 + $0x158] sm:$0xff]  ;;  %v305_v28 = vld [vmem:[#allocation7 + $0x1e0] sm:$0xff]  ;;  %v579_v29 = vpack.c.bf16 %v274_v27, %v273_v26  ;;  %v306_v30 = vld [vmem:[#allocation7 + $0x1e8] sm:$0xff] }
  0x4d   :  { %600 = vmatprep.subr.bf16.mxu1 %v599_v61  ;;  %v609_v25 = vpack.c.bf16 %v288_v24, %v287_v23  ;;  %v257_v31 = vld [vmem:[#allocation7 + $0x60] sm:$0xff]  ;;  %v258_v32 = vld [vmem:[#allocation7 + $0x68] sm:$0xff]  ;;  %v611_v33 = vpack.c.bf16 %v306_v30, %v305_v28  ;;  %v275_v37 = vld [vmem:[#allocation7 + $0xf0] sm:$0xff]  ;;  %v77_v52 = vsub.s32 0, %v76_v51  ;;  %v85_v54 = vsub.s32 2, %v76_v51 }
  0x4e   :  { %v581_v34 = vpack.c.bf16 %v258_v32, %v257_v31  ;;  %v289_v35 = vld [vmem:[#allocation7 + $0x160] sm:$0xff]  ;;  %v290_v36 = vld [vmem:[#allocation7 + $0x168] sm:$0xff]  ;;  %v276_v39 = vld [vmem:[#allocation7 + $0xf8] sm:$0xff]  ;;  %v81_v55 = vsub.s32 1, %v76_v51  ;;  %v89_v56 = vsub.s32 3, %v76_v51 }
  0x4f   :  { %570 = vmatpush3.bf16.msra.mxu0 %v569_v0  ;;  %v613_v38 = vpack.c.bf16 %v290_v36, %v289_v35  ;;  %v307_v40 = vld [vmem:[#allocation7 + $0x1f0] sm:$0xff]  ;;  %v308_v41 = vld [vmem:[#allocation7 + $0x1f8] sm:$0xff]  ;;  %v583_v42 = vpack.c.bf16 %v276_v39, %v275_v37 }
  0x50   :  { %602 = vmatpush3.bf16.msra.mxu1 %v601_v1  ;;  %572 = vmatprep.subr.bf16.mxu0 %v571_v5  ;;  %v615_v43 = vpack.c.bf16 %v308_v41, %v307_v40  ;;  %v259_v44 = vld [vmem:[#allocation7 + $0x70] sm:$0xff]  ;;  %v260_v45 = vld [vmem:[#allocation7 + $0x78] sm:$0xff] }
  0x51   :  { %604 = vmatprep.subr.bf16.mxu1 %v603_v7  ;;  %v291_v46 = vld [vmem:[#allocation7 + $0x170] sm:$0xff]  ;;  %v585_v47 = vpack.c.bf16 %v260_v45, %v259_v44  ;;  %v292_v48 = vld [vmem:[#allocation7 + $0x178] sm:$0xff] }
  0x52   :  { %v617_v49 = vpack.c.bf16 %v292_v48, %v291_v46  ;;  %v73_v53 = vld [vmem:[%s829_s2] sm:$0xf] }
  0x53   :  { %574 = vmatpush3.bf16.msra.mxu0 %v573_v11  ;;  %v78_v57 = vrot.slane %v73_v53, %v77_v52  ;;  %v86_v58 = vrot.slane %v73_v53, %v85_v54  ;;  %v82_v59 = vrot.slane %v73_v53, %v81_v55  ;;  %v90_v60 = vrot.slane %v73_v53, %v89_v56  ;;  %v476_v11 = vld [vmem:[%s831_s4] ss:$0 sm:$0xff] }
  0x54   :  { %606 = vmatpush3.bf16.msra.mxu1 %v605_v13  ;;  %576 = vmatprep.subr.bf16.mxu0 %v575_v17 }
  0x55   :  { %608 = vmatprep.subr.bf16.mxu1 %v607_v21 }
  0x57   :  { %578 = vmatpush3.bf16.msra.mxu0 %v577_v22 }
  0x58   :  { %610 = vmatpush3.bf16.msra.mxu1 %v609_v25  ;;  %580 = vmatprep.subr.bf16.mxu0 %v579_v29 }
  0x59   :  { %612 = vmatprep.subr.bf16.mxu1 %v611_v33 }
  0x5b   :  { %582 = vmatpush3.bf16.msra.mxu0 %v581_v34 }
  0x5c   :  { %614 = vmatpush3.bf16.msra.mxu1 %v613_v38  ;;  %584 = vmatprep.subr.bf16.mxu0 %v583_v42 }
  0x5d   :  { %616 = vmatprep.subr.bf16.mxu1 %v615_v43 }
  0x5f   :  { %586 = vmatpush3.bf16.msra.mxu0 %v585_v47 }
  0x60   :  { %618 = vmatpush3.bf16.msra.mxu1 %v617_v49 }
 0x114   :  { %v165_v61 = vpop.f32.mrb[0].mxu0 }
 0x115   :  { %v166_v62 = vadd.f32 %v165_v61, %v78_v57  ;;  %v236_v63 = vpop.f32.mrb[0].mxu1  ;;  %v167_v0 = vpop.f32.mrb[1].mxu0 }
 0x116   :  { %v237_v1 = vadd.f32 %v236_v63, %v86_v58  ;;  %v168_v2 = vadd.f32 %v167_v0, %v82_v59  ;;  %v238_v3 = vpop.f32.mrb[1].mxu1 }
 0x117   :  { %628 = vtanh.f32 %v166_v62  ;;  %v239_v4 = vadd.f32 %v238_v3, %v90_v60 }
 0x118   :  { %630 = vtanh.f32 %v237_v1 }
 0x119   :  { %632 = vtanh.f32 %v168_v2 }
 0x11a   :  { %634 = vtanh.f32 %v239_v4 }
 0x121   :  { %v629_v5 = vpop.eup %628 }
 0x122   :  { %v631_v6 = vpop.eup %630 }
 0x123   :  { %v633_v7 = vpop.eup %632 }
 0x124   :  { %v635_v8 = vpop.eup %634  ;;  %380 = vmatprep.mubr.f32.mxu0 %v633_v7 }
 0x125   :  { %450 = vmatprep.mubr.f32.mxu1 %v635_v8  ;;  %381 = vmatmul.mubr.f32.vlgmr.msra.gmra.mrb[2].mxu0 %v629_v5 }
 0x126   :  { %451 = vmatmul.mubr.f32.vlgmr.msra.gmra.mrb[2].mxu1 %v631_v6 }
 0x1f8   :  { %v509_v9 = vpop.f32.mrb[2].mxu0 }
 0x1f9   :  { %v544_v10 = vpop.f32.mrb[2].mxu1  ;;  %v510_v12 = vpop.f32.mrb[3].mxu0 }
 0x1fa   :  { %v511_v13 = vadd.f32 %v510_v12, %v509_v9  ;;  %v545_v14 = vpop.f32.mrb[3].mxu1 }
 0x1fb   :  { %v546_v15 = vadd.f32 %v545_v14, %v544_v10 }
 0x1fc   :  { %v383_v16 = vadd.f32 %v511_v13, %v476_v11 }
 0x1fe   :  { %v453_v17 = vadd.f32 %v546_v15, %v383_v16 }
 0x200   :  { %636 = vtanh.f32 %v453_v17 }
 0x20a   :  { %v637_v18 = vpop.eup %636 }
 0x20b   :  { %457 = vst [vmem:[#allocation8] sm:$0xff] %v637_v18 }
 0x20c   :  { %715 = shalt.err (!%p712_p0)
}
 0x20d   :  { %s716_s12 = scalar_lea.hbm %s832_s5, 128 }
 0x20e   :  { %p717_p1 = scmp.ne.s32.totalorder %s832_s5, %s716_s12  ;;  %p720_p2 = scmp.lt.u32.totalorder %s716_s12, %s832_s5 }
 0x210   :  { %p722_p3 = pnand %p720_p2, %p717_p1 }
 0x212   :  { %725 = shalt.err (!%p722_p3)
}
 0x213   :  { %467 = dma.vmem_to_hbm [thread:$0]  %s465_s9, 128, %s832_s5, [#allocation4]  }
 0x214   :  { %730 = dma.done.wait [#allocation4], 128  }
 0x215   :  { %731 = vsyncadd [#allocation4], 4294967168 }
 0x216   :  { %471 = vsyncpa [#allocation3], 1 }
 0x217   :  { %472 = vsyncpa [#allocation6], 1 }
 0x218   :  { %473 = vsyncpa [#allocation4], 1 }

</bundles_post_ra>
